<compile_context>
chip_gen: v5e
topology: v5e:2x2
jax: 0.10.0
libtpu: 0.0.40
codegen_flags: <defaults>
</compile_context>

<pallas_src>
import functools

import jax
import jax.numpy as jnp
from jax.experimental import pallas as pl
from jax.experimental.pallas import tpu as pltpu


def _ghost_kernel(x_ref, w1_ref, b1_ref, wd_ref, b2_ref, mask_ref, o_ref, *,
                  cin, K, W, NHW, use_mxu):
    # x_ref   : (cin,   NHW)   input, batch folded onto lanes (NHW = N*H*W)
    # w1_ref  : (c_init, cin)  primary 1x1 weights (BN1 scale folded)
    # b1_ref  : (c_init, 1)    fused BN1 bias
    # wd_ref  : (c_new, K*K)   depthwise weights, one column per tap (BN2 scale folded)
    # b2_ref  : (c_new, 1)     fused BN2 bias
    # mask_ref: (K*K,  NHW)    per-tap row/col validity mask (1.0 valid / 0.0 halo)
    # o_ref   : (c_init+c_new, NHW)  output = concat([x1, x2], channel axis)
    x = x_ref[...]                                            # (cin, NHW) f32

    # ---- primary conv (1x1, BN1 scale pre-folded) + bias + ReLU --------------------------
    if use_mxu:
        # Non-trivial channel counts: one MXU matmul instead of a VALU-bound MAC chain.
        acc1 = jnp.dot(w1_ref[...], x, preferred_element_type=jnp.float32) + b1_ref[...]
    else:
        # Tiny channels: per-row broadcast MACs on the VPU; fold the bias into the first MAC.
        acc1 = w1_ref[:, 0:1] * x[0:1, :] + b1_ref[...]       # (c_init,1)*(1,NHW) + (c_init,1)
        for ci in range(1, cin):
            acc1 = acc1 + w1_ref[:, ci:ci + 1] * x[ci:ci + 1, :]
    x1 = jnp.maximum(acc1, 0.0)                               # (c_init, NHW)

    # ---- cheap operation: depthwise KxK conv (BN2 scale pre-folded) + bias + ReLU --------
    # Each tap is x1 rotated along the lane axis by the flattened offset dh*W+dw and masked by
    # the precomputed validity mask (covers row/col halos AND cross-image bleed of the lane
    # fold).  pltpu.roll runs on the XLU slot, so the taps co-issue with the VPU MACs.
    p = K // 2
    center = p * K + p                                        # tap (dh=0, dw=0): no roll, no mask
    acc2 = wd_ref[:, center:center + 1] * x1 + b2_ref[...]    # centre MAC + bias in one pass
    for t in range(K * K):
        if t == center:
            continue
        dh, dw = t // K - p, t % K - p
        off = dh * W + dw
        tap = pltpu.roll(x1, shift=(-off) % NHW, axis=1)      # tap[i] = x1[i + off]
        acc2 = acc2 + wd_ref[:, t:t + 1] * (tap * mask_ref[t:t + 1, :])
    x2 = jnp.maximum(acc2, 0.0)                               # (c_new, NHW)

    # ---- channel concat: single full-width lane-dense store ------------------------------
    o_ref[...] = jnp.concatenate([x1, x2], axis=0)


def ghost_module(x, w_primary, gamma1, beta1, mean1, var1,
                 w_dw, gamma2, beta2, mean2, var2,
                 *, kernel_size=1, dw_size=3, stride=1, eps=1e-5):
    """x: (N, Cin, H, W) f32.  w_primary: (Cinit, Cin).  w_dw: (Cnew, K, K) depthwise."""
    N, cin, H, W = x.shape
    c_init = w_primary.shape[0]
    c_new = w_dw.shape[0]
    K = dw_size
    assert kernel_size == 1 and stride == 1, "only GhostModule defaults implemented"
    assert K % 2 == 1, "dw_size must be odd (PyTorch padding = dw_size // 2)"
    assert c_new == c_init, "only ratio == 2 implemented"

    HW = H * W
    NHW = N * HW
    # Lane-dense stores / full-width VPU ops require the folded spatial axis to be 128-aligned.
    assert NHW % 128 == 0, "N*H*W must be a multiple of 128 for lane-dense layout"

    # Fuse BatchNorm (inference) into per-channel scale/bias and fold the scales into weights.
    s1 = gamma1 / jnp.sqrt(var1 + eps)
    b1 = beta1 - mean1 * s1
    s2 = gamma2 / jnp.sqrt(var2 + eps)
    b2 = beta2 - mean2 * s2

    w1s = w_primary * s1[:, None]                               # (c_init, cin)
    wds = (w_dw * s2[:, None, None]).reshape(c_new, K * K)      # (c_new, K*K)
    b1c = b1[:, None]                                           # (c_init, 1)
    b2c = b2[:, None]                                           # (c_new, 1)

    # Grid-invariant per-tap validity masks (row/col inside each image), DMA'd once.
    pos = jnp.arange(NHW, dtype=jnp.int32)
    col = pos % W
    row = (pos // W) % H
    p = K // 2
    masks = []
    for kh in range(K):
        for kw in range(K):
            dh, dw = kh - p, kw - p
            valid = (row + dh >= 0) & (row + dh < H) & (col + dw >= 0) & (col + dw < W)
            masks.append(valid.astype(jnp.float32))
    tap_mask = jnp.stack(masks, axis=0)                         # (K*K, NHW)

    # Fold the batch onto the lane axis (layout plumbing in the wrapper, tiny XLA transpose).
    x_flat = jnp.transpose(x, (1, 0, 2, 3)).reshape(cin, NHW)   # (cin, N*H*W)

    oup = c_init + c_new
    use_mxu = (cin >= 16 and c_init >= 16)   # MXU only pays off for non-trivial channel counts

    kernel = functools.partial(_ghost_kernel, cin=cin, K=K, W=W, NHW=NHW, use_mxu=use_mxu)

    out_flat = pl.pallas_call(
        kernel,
        out_shape=jax.ShapeDtypeStruct((oup, NHW), jnp.float32),
        grid=(1,),                                              # whole module in one step
        in_specs=[
            pl.BlockSpec((cin, NHW), lambda i: (0, 0)),
            pl.BlockSpec((c_init, cin), lambda i: (0, 0)),
            pl.BlockSpec((c_init, 1), lambda i: (0, 0)),
            pl.BlockSpec((c_new, K * K), lambda i: (0, 0)),
            pl.BlockSpec((c_new, 1), lambda i: (0, 0)),
            pl.BlockSpec((K * K, NHW), lambda i: (0, 0)),
        ],
        out_specs=pl.BlockSpec((oup, NHW), lambda i: (0, 0)),
        compiler_params=pltpu.CompilerParams(
            dimension_semantics=("arbitrary",)),
    )(x_flat, w1s, b1c, wds, b2c, tap_mask)

    return jnp.transpose(out_flat.reshape(oup, N, H, W), (1, 0, 2, 3))


def _reference(x, w_primary, gamma1, beta1, mean1, var1,
               w_dw, gamma2, beta2, mean2, var2, *, dw_size, eps=1e-5):
    """Pure-JAX reference: 1x1 conv -> BN -> ReLU -> depthwise conv -> BN -> ReLU -> concat."""
    c_init = w_primary.shape[0]
    K = dw_size
    p = K // 2
    y1 = jax.lax.conv_general_dilated(
        x, w_primary[:, :, None, None], (1, 1), ((0, 0), (0, 0)),
        dimension_numbers=("NCHW", "OIHW", "NCHW"),
        precision=jax.lax.Precision.HIGHEST)
    s1 = gamma1 / jnp.sqrt(var1 + eps)
    b1 = beta1 - mean1 * s1
    y1 = jnp.maximum(y1 * s1[None, :, None, None] + b1[None, :, None, None], 0.0)
    y2 = jax.lax.conv_general_dilated(
        y1, w_dw[:, None, :, :], (1, 1), ((p, p), (p, p)),
        dimension_numbers=("NCHW", "OIHW", "NCHW"),
        feature_group_count=c_init,
        precision=jax.lax.Precision.HIGHEST)
    s2 = gamma2 / jnp.sqrt(var2 + eps)
    b2 = beta2 - mean2 * s2
    y2 = jnp.maximum(y2 * s2[None, :, None, None] + b2[None, :, None, None], 0.0)
    return jnp.concatenate([y1, y2], axis=1)


if __name__ == "__main__":
    # GhostModule(inp=4, oup=4, kernel_size=1, ratio=2, dw_size=3, stride=1, relu=True)
    N, inp, H, W = 2, 4, 16, 16
    oup, ratio, dw_size = 4, 2, 3
    c_init = oup // ratio
    c_new = c_init * (ratio - 1)

    key = jax.random.PRNGKey(0)
    keys = jax.random.split(key, 11)
    x = jax.random.normal(keys[0], (N, inp, H, W), dtype=jnp.float32)
    # primary 1x1 conv weight (Cinit, Cin); depthwise weight (Cnew, K, K)
    w_primary = jax.random.normal(keys[1], (c_init, inp), dtype=jnp.float32) * 0.3
    gamma1 = jax.random.normal(keys[2], (c_init,), dtype=jnp.float32) * 0.1 + 1.0
    beta1 = jax.random.normal(keys[3], (c_init,), dtype=jnp.float32) * 0.1
    mean1 = jax.random.normal(keys[4], (c_init,), dtype=jnp.float32) * 0.1
    var1 = jax.random.uniform(keys[5], (c_init,), dtype=jnp.float32, minval=0.5, maxval=1.5)
    w_dw = jax.random.normal(keys[6], (c_new, dw_size, dw_size), dtype=jnp.float32) * 0.2
    gamma2 = jax.random.normal(keys[7], (c_new,), dtype=jnp.float32) * 0.1 + 1.0
    beta2 = jax.random.normal(keys[8], (c_new,), dtype=jnp.float32) * 0.1
    mean2 = jax.random.normal(keys[9], (c_new,), dtype=jnp.float32) * 0.1
    var2 = jax.random.uniform(keys[10], (c_new,), dtype=jnp.float32, minval=0.5, maxval=1.5)

    out = ghost_module(x, w_primary, gamma1, beta1, mean1, var1,
                       w_dw, gamma2, beta2, mean2, var2,
                       kernel_size=1, dw_size=dw_size, stride=1)
    out = jax.block_until_ready(out)

    ref = _reference(x, w_primary, gamma1, beta1, mean1, var1,
                     w_dw, gamma2, beta2, mean2, var2, dw_size=dw_size)
    assert out.shape == (N, oup, H, W)
    assert jnp.allclose(out, ref, atol=1e-4, rtol=1e-4), "mismatch vs reference"

    print("KERNEL_OK")
</pallas_src>

<mosaic_0001>
module attributes {stable_mosaic.version = 11 : i64} {
  func.func @_ghost_kernel(%arg0: i32, %arg1: memref<4x512xf32, #tpu.memory_space<vmem>>, %arg2: memref<2x4xf32, #tpu.memory_space<vmem>>, %arg3: memref<2x1xf32, #tpu.memory_space<vmem>>, %arg4: memref<2x9xf32, #tpu.memory_space<vmem>>, %arg5: memref<2x1xf32, #tpu.memory_space<vmem>>, %arg6: memref<9x512xf32, #tpu.memory_space<vmem>>, %arg7: memref<4x512xf32, #tpu.memory_space<vmem>>) attributes {dimension_semantics = [#tpu.dimension_semantics<arbitrary>], iteration_bounds = array<i64: 1>, scalar_prefetch = 0 : i64, scratch_operands = 0 : i64, tpu.core_type = #tpu.core_type<tc>, window_params = [{pipeline_mode = #tpu.pipeline_mode<synchronous>, transform_indices = @transform_0, window_bounds = array<i64: 4, 512>}, {pipeline_mode = #tpu.pipeline_mode<synchronous>, transform_indices = @transform_1, window_bounds = array<i64: 2, 4>}, {pipeline_mode = #tpu.pipeline_mode<synchronous>, transform_indices = @transform_2, window_bounds = array<i64: 2, 1>}, {pipeline_mode = #tpu.pipeline_mode<synchronous>, transform_indices = @transform_3, window_bounds = array<i64: 2, 9>}, {pipeline_mode = #tpu.pipeline_mode<synchronous>, transform_indices = @transform_4, window_bounds = array<i64: 2, 1>}, {pipeline_mode = #tpu.pipeline_mode<synchronous>, transform_indices = @transform_5, window_bounds = array<i64: 9, 512>}, {pipeline_mode = #tpu.pipeline_mode<synchronous>, transform_indices = @transform_6, window_bounds = array<i64: 4, 512>}]} {
    %c0 = arith.constant 0 : index
    %c0_0 = arith.constant 0 : index
    %0 = vector.load %arg1[%c0, %c0_0] : memref<4x512xf32, #tpu.memory_space<vmem>>, vector<4x512xf32>
    %c0_1 = arith.constant 0 : index
    %c0_2 = arith.constant 0 : index
    %1 = vector.load %arg2[%c0_1, %c0_2] : memref<2x4xf32, #tpu.memory_space<vmem>>, vector<2x1xf32>
    %2 = vector.extract_strided_slice %0 {offsets = [0, 0], sizes = [1, 512], strides = [1, 1]} : vector<4x512xf32> to vector<1x512xf32>
    %3 = vector.broadcast %1 : vector<2x1xf32> to vector<2x512xf32>
    %4 = vector.broadcast %2 : vector<1x512xf32> to vector<2x512xf32>
    %5 = arith.mulf %3, %4 : vector<2x512xf32>
    %c0_3 = arith.constant 0 : index
    %c0_4 = arith.constant 0 : index
    %6 = vector.load %arg3[%c0_3, %c0_4] : memref<2x1xf32, #tpu.memory_space<vmem>>, vector<2x1xf32>
    %7 = vector.broadcast %6 : vector<2x1xf32> to vector<2x512xf32>
    %8 = arith.addf %5, %7 : vector<2x512xf32>
    %c0_5 = arith.constant 0 : index
    %c1 = arith.constant 1 : index
    %9 = vector.load %arg2[%c0_5, %c1] : memref<2x4xf32, #tpu.memory_space<vmem>>, vector<2x1xf32>
    %10 = vector.extract_strided_slice %0 {offsets = [1, 0], sizes = [1, 512], strides = [1, 1]} : vector<4x512xf32> to vector<1x512xf32>
    %11 = vector.broadcast %9 : vector<2x1xf32> to vector<2x512xf32>
    %12 = vector.broadcast %10 : vector<1x512xf32> to vector<2x512xf32>
    %13 = arith.mulf %11, %12 : vector<2x512xf32>
    %14 = arith.addf %8, %13 : vector<2x512xf32>
    %c0_6 = arith.constant 0 : index
    %c2 = arith.constant 2 : index
    %15 = vector.load %arg2[%c0_6, %c2] : memref<2x4xf32, #tpu.memory_space<vmem>>, vector<2x1xf32>
    %16 = vector.extract_strided_slice %0 {offsets = [2, 0], sizes = [1, 512], strides = [1, 1]} : vector<4x512xf32> to vector<1x512xf32>
    %17 = vector.broadcast %15 : vector<2x1xf32> to vector<2x512xf32>
    %18 = vector.broadcast %16 : vector<1x512xf32> to vector<2x512xf32>
    %19 = arith.mulf %17, %18 : vector<2x512xf32>
    %20 = arith.addf %14, %19 : vector<2x512xf32>
    %c0_7 = arith.constant 0 : index
    %c3 = arith.constant 3 : index
    %21 = vector.load %arg2[%c0_7, %c3] : memref<2x4xf32, #tpu.memory_space<vmem>>, vector<2x1xf32>
    %22 = vector.extract_strided_slice %0 {offsets = [3, 0], sizes = [1, 512], strides = [1, 1]} : vector<4x512xf32> to vector<1x512xf32>
    %23 = vector.broadcast %21 : vector<2x1xf32> to vector<2x512xf32>
    %24 = vector.broadcast %22 : vector<1x512xf32> to vector<2x512xf32>
    %25 = arith.mulf %23, %24 : vector<2x512xf32>
    %26 = arith.addf %20, %25 : vector<2x512xf32>
    %cst = arith.constant 0.000000e+00 : f32
    %27 = vector.broadcast %cst : f32 to vector<2x512xf32>
    %28 = arith.maximumf %26, %27 : vector<2x512xf32>
    %c0_8 = arith.constant 0 : index
    %c4 = arith.constant 4 : index
    %29 = vector.load %arg4[%c0_8, %c4] : memref<2x9xf32, #tpu.memory_space<vmem>>, vector<2x1xf32>
    %30 = vector.broadcast %29 : vector<2x1xf32> to vector<2x512xf32>
    %31 = arith.mulf %30, %28 : vector<2x512xf32>
    %c0_9 = arith.constant 0 : index
    %c0_10 = arith.constant 0 : index
    %32 = vector.load %arg5[%c0_9, %c0_10] : memref<2x1xf32, #tpu.memory_space<vmem>>, vector<2x1xf32>
    %33 = vector.broadcast %32 : vector<2x1xf32> to vector<2x512xf32>
    %34 = arith.addf %31, %33 : vector<2x512xf32>
    %c17_i32 = arith.constant 17 : i32
    %35 = tpu.dynamic_rotate %28 by %c17_i32 dim 1 : vector<2x512xf32>, i32 -> vector<2x512xf32>
    %c0_11 = arith.constant 0 : index
    %c0_12 = arith.constant 0 : index
    %36 = vector.load %arg4[%c0_11, %c0_12] : memref<2x9xf32, #tpu.memory_space<vmem>>, vector<2x1xf32>
    %c0_13 = arith.constant 0 : index
    %c0_14 = arith.constant 0 : index
    %37 = vector.load %arg6[%c0_13, %c0_14] : memref<9x512xf32, #tpu.memory_space<vmem>>, vector<1x512xf32>
    %38 = vector.broadcast %37 : vector<1x512xf32> to vector<2x512xf32>
    %39 = arith.mulf %35, %38 : vector<2x512xf32>
    %40 = vector.broadcast %36 : vector<2x1xf32> to vector<2x512xf32>
    %41 = arith.mulf %40, %39 : vector<2x512xf32>
    %42 = arith.addf %34, %41 : vector<2x512xf32>
    %c16_i32 = arith.constant 16 : i32
    %43 = tpu.dynamic_rotate %28 by %c16_i32 dim 1 : vector<2x512xf32>, i32 -> vector<2x512xf32>
    %c0_15 = arith.constant 0 : index
    %c1_16 = arith.constant 1 : index
    %44 = vector.load %arg4[%c0_15, %c1_16] : memref<2x9xf32, #tpu.memory_space<vmem>>, vector<2x1xf32>
    %c1_17 = arith.constant 1 : index
    %c0_18 = arith.constant 0 : index
    %45 = vector.load %arg6[%c1_17, %c0_18] : memref<9x512xf32, #tpu.memory_space<vmem>>, vector<1x512xf32>
    %46 = vector.broadcast %45 : vector<1x512xf32> to vector<2x512xf32>
    %47 = arith.mulf %43, %46 : vector<2x512xf32>
    %48 = vector.broadcast %44 : vector<2x1xf32> to vector<2x512xf32>
    %49 = arith.mulf %48, %47 : vector<2x512xf32>
    %50 = arith.addf %42, %49 : vector<2x512xf32>
    %c15_i32 = arith.constant 15 : i32
    %51 = tpu.dynamic_rotate %28 by %c15_i32 dim 1 : vector<2x512xf32>, i32 -> vector<2x512xf32>
    %c0_19 = arith.constant 0 : index
    %c2_20 = arith.constant 2 : index
    %52 = vector.load %arg4[%c0_19, %c2_20] : memref<2x9xf32, #tpu.memory_space<vmem>>, vector<2x1xf32>
    %c2_21 = arith.constant 2 : index
    %c0_22 = arith.constant 0 : index
    %53 = vector.load %arg6[%c2_21, %c0_22] : memref<9x512xf32, #tpu.memory_space<vmem>>, vector<1x512xf32>
    %54 = vector.broadcast %53 : vector<1x512xf32> to vector<2x512xf32>
    %55 = arith.mulf %51, %54 : vector<2x512xf32>
    %56 = vector.broadcast %52 : vector<2x1xf32> to vector<2x512xf32>
    %57 = arith.mulf %56, %55 : vector<2x512xf32>
    %58 = arith.addf %50, %57 : vector<2x512xf32>
    %c1_i32 = arith.constant 1 : i32
    %59 = tpu.dynamic_rotate %28 by %c1_i32 dim 1 : vector<2x512xf32>, i32 -> vector<2x512xf32>
    %c0_23 = arith.constant 0 : index
    %c3_24 = arith.constant 3 : index
    %60 = vector.load %arg4[%c0_23, %c3_24] : memref<2x9xf32, #tpu.memory_space<vmem>>, vector<2x1xf32>
    %c3_25 = arith.constant 3 : index
    %c0_26 = arith.constant 0 : index
    %61 = vector.load %arg6[%c3_25, %c0_26] : memref<9x512xf32, #tpu.memory_space<vmem>>, vector<1x512xf32>
    %62 = vector.broadcast %61 : vector<1x512xf32> to vector<2x512xf32>
    %63 = arith.mulf %59, %62 : vector<2x512xf32>
    %64 = vector.broadcast %60 : vector<2x1xf32> to vector<2x512xf32>
    %65 = arith.mulf %64, %63 : vector<2x512xf32>
    %66 = arith.addf %58, %65 : vector<2x512xf32>
    %c511_i32 = arith.constant 511 : i32
    %67 = tpu.dynamic_rotate %28 by %c511_i32 dim 1 : vector<2x512xf32>, i32 -> vector<2x512xf32>
    %c0_27 = arith.constant 0 : index
    %c5 = arith.constant 5 : index
    %68 = vector.load %arg4[%c0_27, %c5] : memref<2x9xf32, #tpu.memory_space<vmem>>, vector<2x1xf32>
    %c5_28 = arith.constant 5 : index
    %c0_29 = arith.constant 0 : index
    %69 = vector.load %arg6[%c5_28, %c0_29] : memref<9x512xf32, #tpu.memory_space<vmem>>, vector<1x512xf32>
    %70 = vector.broadcast %69 : vector<1x512xf32> to vector<2x512xf32>
    %71 = arith.mulf %67, %70 : vector<2x512xf32>
    %72 = vector.broadcast %68 : vector<2x1xf32> to vector<2x512xf32>
    %73 = arith.mulf %72, %71 : vector<2x512xf32>
    %74 = arith.addf %66, %73 : vector<2x512xf32>
    %c497_i32 = arith.constant 497 : i32
    %75 = tpu.dynamic_rotate %28 by %c497_i32 dim 1 : vector<2x512xf32>, i32 -> vector<2x512xf32>
    %c0_30 = arith.constant 0 : index
    %c6 = arith.constant 6 : index
    %76 = vector.load %arg4[%c0_30, %c6] : memref<2x9xf32, #tpu.memory_space<vmem>>, vector<2x1xf32>
    %c6_31 = arith.constant 6 : index
    %c0_32 = arith.constant 0 : index
    %77 = vector.load %arg6[%c6_31, %c0_32] : memref<9x512xf32, #tpu.memory_space<vmem>>, vector<1x512xf32>
    %78 = vector.broadcast %77 : vector<1x512xf32> to vector<2x512xf32>
    %79 = arith.mulf %75, %78 : vector<2x512xf32>
    %80 = vector.broadcast %76 : vector<2x1xf32> to vector<2x512xf32>
    %81 = arith.mulf %80, %79 : vector<2x512xf32>
    %82 = arith.addf %74, %81 : vector<2x512xf32>
    %c496_i32 = arith.constant 496 : i32
    %83 = tpu.dynamic_rotate %28 by %c496_i32 dim 1 : vector<2x512xf32>, i32 -> vector<2x512xf32>
    %c0_33 = arith.constant 0 : index
    %c7 = arith.constant 7 : index
    %84 = vector.load %arg4[%c0_33, %c7] : memref<2x9xf32, #tpu.memory_space<vmem>>, vector<2x1xf32>
    %c7_34 = arith.constant 7 : index
    %c0_35 = arith.constant 0 : index
    %85 = vector.load %arg6[%c7_34, %c0_35] : memref<9x512xf32, #tpu.memory_space<vmem>>, vector<1x512xf32>
    %86 = vector.broadcast %85 : vector<1x512xf32> to vector<2x512xf32>
    %87 = arith.mulf %83, %86 : vector<2x512xf32>
    %88 = vector.broadcast %84 : vector<2x1xf32> to vector<2x512xf32>
    %89 = arith.mulf %88, %87 : vector<2x512xf32>
    %90 = arith.addf %82, %89 : vector<2x512xf32>
    %c495_i32 = arith.constant 495 : i32
    %91 = tpu.dynamic_rotate %28 by %c495_i32 dim 1 : vector<2x512xf32>, i32 -> vector<2x512xf32>
    %c0_36 = arith.constant 0 : index
    %c8 = arith.constant 8 : index
    %92 = vector.load %arg4[%c0_36, %c8] : memref<2x9xf32, #tpu.memory_space<vmem>>, vector<2x1xf32>
    %c8_37 = arith.constant 8 : index
    %c0_38 = arith.constant 0 : index
    %93 = vector.load %arg6[%c8_37, %c0_38] : memref<9x512xf32, #tpu.memory_space<vmem>>, vector<1x512xf32>
    %94 = vector.broadcast %93 : vector<1x512xf32> to vector<2x512xf32>
    %95 = arith.mulf %91, %94 : vector<2x512xf32>
    %96 = vector.broadcast %92 : vector<2x1xf32> to vector<2x512xf32>
    %97 = arith.mulf %96, %95 : vector<2x512xf32>
    %98 = arith.addf %90, %97 : vector<2x512xf32>
    %cst_39 = arith.constant 0.000000e+00 : f32
    %99 = vector.broadcast %cst_39 : f32 to vector<2x512xf32>
    %100 = arith.maximumf %98, %99 : vector<2x512xf32>
    %101 = tpu.concatenate %28, %100 in 0 : vector<2x512xf32>, vector<2x512xf32> -> vector<4x512xf32>
    %c0_40 = arith.constant 0 : index
    %c0_41 = arith.constant 0 : index
    %102 = vector.load %arg7[%c0_40, %c0_41] : memref<4x512xf32, #tpu.memory_space<vmem>>, vector<4x512xf32>
    tpu.vector_store %arg7[%c0_40, %c0_41], %101 {strides = array<i32>} : memref<4x512xf32, #tpu.memory_space<vmem>>, vector<4x512xf32>,
    return
  }
  func.func @transform_0(%arg0: i32) -> (i32, i32) {
    %c0_i32 = arith.constant 0 : i32
    %c0_i32_0 = arith.constant 0 : i32
    %c0_i32_1 = arith.constant 0 : i32
    return %c0_i32, %c0_i32_0 : i32, i32
  }
  func.func @transform_1(%arg0: i32) -> (i32, i32) {
    %c0_i32 = arith.constant 0 : i32
    %c0_i32_0 = arith.constant 0 : i32
    %c0_i32_1 = arith.constant 0 : i32
    return %c0_i32, %c0_i32_0 : i32, i32
  }
  func.func @transform_2(%arg0: i32) -> (i32, i32) {
    %c0_i32 = arith.constant 0 : i32
    %c0_i32_0 = arith.constant 0 : i32
    %c0_i32_1 = arith.constant 0 : i32
    return %c0_i32, %c0_i32_0 : i32, i32
  }
  func.func @transform_3(%arg0: i32) -> (i32, i32) {
    %c0_i32 = arith.constant 0 : i32
    %c0_i32_0 = arith.constant 0 : i32
    %c0_i32_1 = arith.constant 0 : i32
    return %c0_i32, %c0_i32_0 : i32, i32
  }
  func.func @transform_4(%arg0: i32) -> (i32, i32) {
    %c0_i32 = arith.constant 0 : i32
    %c0_i32_0 = arith.constant 0 : i32
    %c0_i32_1 = arith.constant 0 : i32
    return %c0_i32, %c0_i32_0 : i32, i32
  }
  func.func @transform_5(%arg0: i32) -> (i32, i32) {
    %c0_i32 = arith.constant 0 : i32
    %c0_i32_0 = arith.constant 0 : i32
    %c0_i32_1 = arith.constant 0 : i32
    return %c0_i32, %c0_i32_0 : i32, i32
  }
  func.func @transform_6(%arg0: i32) -> (i32, i32) {
    %c0_i32 = arith.constant 0 : i32
    %c0_i32_0 = arith.constant 0 : i32
    %c0_i32_1 = arith.constant 0 : i32
    return %c0_i32, %c0_i32_0 : i32, i32
  }
}

</mosaic_0001>

<bundles_post_ra>
// kernel: tpu_custom_call.1
= control target key start
LH: loop header
LB: loop body
LE: loop exit
PB: predicated region body
PF: predicated region fallthrough
CT: control target
= control target key end

     0   :  { %11 = vsyncpa [#allocation3], 0  ;;  %s934_s0 = inlined_call_operand.hbm [shape: f32[4,512], index: 0, kind: input, shape index: {}]   ;;  %s935_s1 = inlined_call_operand.vmem [shape: f32[2,4], index: 1, kind: input, shape index: {}]   ;;  %s936_s2 = inlined_call_operand.vmem [shape: f32[2,1], index: 2, kind: input, shape index: {}]   ;;  %s937_s3 = inlined_call_operand.vmem [shape: f32[2,9], index: 3, kind: input, shape index: {}]   ;;  %s938_s4 = inlined_call_operand.vmem [shape: f32[2,1], index: 4, kind: input, shape index: {}]   ;;  %s939_s5 = inlined_call_operand.hbm [shape: f32[9,512], index: 5, kind: input, shape index: {}]   ;;  %s940_s6 = inlined_call_operand.hbm [shape: f32[4,512], index: 6, kind: output, shape index: {}]  }
   0x1   :  { %12 = vsyncpa [#allocation6], 0 }
   0x2   :  { %13 = vsyncpa [#allocation4], 0  ;;  %s19_s23 = sshll.u32 %s934_s0, 4  ;;  %s673_s24 = smov [#allocation2]   ;;  %s20_s23 = int_to_ptr.hbm [resolvable:$true] %s19_s23 }
   0x3   :  { %s21_s25 = sshll.u32 %s673_s24, 4  ;;  %s37_s28 = sshll.u32 %s939_s5, 4  ;;  %s22_s25 = int_to_ptr.vmem [resolvable:$true] %s21_s25  ;;  %s38_s28 = int_to_ptr.hbm [resolvable:$true] %s37_s28 }
   0x4   :  { %24 = dma.hbm_to_vmem [thread:$0]  %s20_s23, 256, %s22_s25, [#allocation3]  }
   0x5   :  { %s674_s29 = smov [#allocation5]   ;;  %s675_s7 = smov 512  }
   0x6   :  { %s39_s30 = sshll.u32 %s674_s29, 4  ;;  %s676_s8 = smov 32   ;;  %s40_s30 = int_to_ptr.vmem [resolvable:$true] %s39_s30 }
   0x7   :  { %45 = dma.hbm_to_vmem [thread:$0]  %s38_s28, 1024, %s40_s30, [#allocation6], %s675_s7, %s675_s7, %s676_s8  }
   0x8   :  { %667 = dma.done.wait [#allocation3], 256  }
   0x9   :  { %668 = vsyncadd [#allocation3], 4294967040 }
   0xa   :  { %669 = dma.done.wait [#allocation6], 1024  }
   0xb   :  { %670 = vsyncadd [#allocation6], 4294966272  ;;  %v677_v0 = vmov 0   ;;  %v678_v1 = vmov 1   ;;  %v679_v2 = vmov 3   ;;  %v680_v6 = vmov 2  }
   0xc   :  { %581 = vset.pattern.permute.xlu0 %v677_v0  ;;  %582 = vset.pattern.permute.xlu1 %v678_v1  ;;  %v56_v3 = vld [vmem:[%s935_s1] sm:$0x3]  ;;  %v681_v7 = vmov 4   ;;  %v682_v9 = vmov 6   ;;  %v683_v10 = vmov 5   ;;  %v55_v12 = vld [vmem:[#allocation2 + $0x8] sm:$0xff] }
   0xd   :  { %584 = vset.pattern.permute.xlu2 %v679_v2  ;;  %59 = vperm.xlu0 %581, %v56_v3   ;;  %v80_v4 = vld [vmem:[%s936_s2] sm:$0x3]  ;;  %v144_v15 = vperm.slane %v55_v12, 3  ;;  %v145_v16 = vperm.slane %v55_v12, 7  ;;  %v66_v19 = vperm.slane %v55_v12, 0  ;;  %v67_v20 = vperm.slane %v55_v12, 4 }
   0xe   :  { %91 = vperm.xlu1 %582, %v56_v3   ;;  %139 = vperm.xlu2 %584, %v56_v3   ;;  %v745_v5 = vld [vmem:[%s937_s3] sm:$0x3]  ;;  %v96_v25 = vperm.slane %v55_v12, 1  ;;  %v97_v26 = vperm.slane %v55_v12, 5  ;;  %v120_v29 = vperm.slane %v55_v12, 2  ;;  %v121_v30 = vperm.slane %v55_v12, 6 }
   0xf   :  { %v176_v8 = vld [vmem:[%s938_s4] sm:$0x3]  ;;  %v152_v33 = vperm.slane %v144_v15, 3  ;;  %v153_v34 = vperm.slane %v145_v16, 3  ;;  %v74_v37 = vperm.slane %v66_v19, 0  ;;  %v75_v38 = vperm.slane %v67_v20, 0 }
  0x10   :  { %v54_v11 = vld [vmem:[#allocation2] sm:$0xff]  ;;  %v104_v41 = vperm.slane %v96_v25, 1  ;;  %v105_v42 = vperm.slane %v97_v26, 1  ;;  %v128_v46 = vperm.slane %v120_v29, 2  ;;  %v129_v47 = vperm.slane %v121_v30, 2  ;;  %s684_s2 = smov 17  }
  0x11   :  { %v142_v13 = vperm.slane %v54_v11, 3  ;;  %v143_v14 = vperm.slane %v54_v11, 7  ;;  %v64_v17 = vperm.slane %v54_v11, 0  ;;  %v65_v18 = vperm.slane %v54_v11, 4  ;;  %s685_s3 = smov 16   ;;  %s686_s4 = smov 15  }
  0x12   :  { %v94_v23 = vperm.slane %v54_v11, 1  ;;  %v95_v24 = vperm.slane %v54_v11, 5  ;;  %v118_v27 = vperm.slane %v54_v11, 2  ;;  %v119_v28 = vperm.slane %v54_v11, 6  ;;  %s688_s14 = smov 112   ;;  %s689_s15 = smov 1  }
  0x13   :  { %v150_v31 = vperm.slane %v142_v13, 3  ;;  %v151_v32 = vperm.slane %v143_v14, 3  ;;  %v72_v35 = vperm.slane %v64_v17, 0  ;;  %v73_v36 = vperm.slane %v65_v18, 0  ;;  %s690_s16 = smov 111   ;;  %s691_s17 = smov 127  }
  0x14   :  { %v102_v39 = vperm.slane %v94_v23, 1  ;;  %v103_v40 = vperm.slane %v95_v24, 1  ;;  %v126_v44 = vperm.slane %v118_v27, 2  ;;  %v127_v45 = vperm.slane %v119_v28, 2  ;;  %s693_s18 = smov 113   ;;  %s694_s19 = smov [#allocation7]  }
  0x15   :  { %83 = vperm.xlu0 %581, %v80_v4   ;;  %vm523_vm8 = vcmask 1041408   ;;  %vm534_vm9 = vcmask 1043456   ;;  %s546_s20 = sshll.u32 %s694_s19, 4  ;;  %s548_s23 = sshll.u32 %s940_s6, 4  ;;  %s547_s20 = int_to_ptr.vmem [resolvable:$true] %s546_s20  ;;  %s549_s23 = int_to_ptr.hbm [resolvable:$true] %s548_s23 }
  0x16   :  { %583 = vset.pattern.permute.xlu1 %v680_v6  ;;  %585 = vset.pattern.permute.xlu2 %v681_v7 }
  0x17   :  { %115 = vperm.xlu1 %583, %v56_v3   ;;  %169 = vperm.xlu2 %585, %v745_v5  }
  0x1d   :  { %179 = vperm.xlu0 %581, %v176_v8  }
  0x1f   :  { %587 = vset.pattern.permute.xlu1 %v678_v1  ;;  %586 = vset.pattern.permute.xlu2 %v677_v0 }
  0x20   :  { %256 = vperm.xlu1 %587, %v745_v5   ;;  %216 = vperm.xlu2 %586, %v745_v5  }
  0x25   :  { %588 = vset.pattern.permute.xlu0 %v680_v6 }
  0x26   :  { %296 = vperm.xlu0 %588, %v745_v5  }
  0x28   :  { %591 = vset.pattern.permute.xlu1 %v682_v9 }
  0x29   :  { %416 = vperm.xlu1 %591, %v745_v5  }
  0x2e   :  { %589 = vset.pattern.permute.xlu0 %v679_v2 }
  0x2f   :  { %336 = vperm.xlu0 %589, %v745_v5  }
  0x37   :  { %590 = vset.pattern.permute.xlu0 %v683_v10 }
  0x38   :  { %376 = vperm.xlu0 %590, %v745_v5  }
  0x68   :  { %v140_v43 = vpop.permute.xlu2 %139 }
  0x69   :  { %v154_v48 = vmul.f32 %v150_v31, %v140_v43  ;;  %v155_v49 = vmul.f32 %v151_v32, %v140_v43  ;;  %v156_v50 = vmul.f32 %v152_v33, %v140_v43  ;;  %v157_v51 = vmul.f32 %v153_v34, %v140_v43 }
  0x6a   :  { %v687_v33 = vmov 7   ;;  %v692_v34 = vmov 8  }
  0x6b   :  { %592 = vset.pattern.permute.xlu0 %v687_v33  ;;  %593 = vset.pattern.permute.xlu1 %v692_v34 }
  0x71   :  { %v170_v19 = vpop.permute.xlu2 %169 }
  0x7f   :  { %v60_v21 = vpop.permute.xlu0 %59 }
  0x80   :  { %v92_v22 = vpop.permute.xlu1 %91  ;;  %v76_v52 = vmul.f32 %v72_v35, %v60_v21  ;;  %v77_v53 = vmul.f32 %v73_v36, %v60_v21  ;;  %v78_v54 = vmul.f32 %v74_v37, %v60_v21  ;;  %v79_v55 = vmul.f32 %v75_v38, %v60_v21  ;;  %v217_v35 = vpop.permute.xlu2 %216 }
  0x81   :  { %v106_v56 = vmul.f32 %v102_v39, %v92_v22  ;;  %v107_v57 = vmul.f32 %v103_v40, %v92_v22  ;;  %v108_v58 = vmul.f32 %v104_v41, %v92_v22  ;;  %v109_v59 = vmul.f32 %v105_v42, %v92_v22 }
  0x82   :  { %v194_v42 = vlaneseq }
  0x87   :  { %v84_v60 = vpop.permute.xlu0 %83 }
  0x88   :  { %v86_v61 = vadd.f32 %v84_v60, %v76_v52  ;;  %v87_v62 = vadd.f32 %v84_v60, %v77_v53  ;;  %v88_v63 = vadd.f32 %v84_v60, %v78_v54  ;;  %v89_v0 = vadd.f32 %v84_v60, %v79_v55 }
  0x89   :  { %v116_v1 = vpop.permute.xlu1 %115 }
  0x8a   :  { %v130_v2 = vmul.f32 %v126_v44, %v116_v1  ;;  %v131_v3 = vmul.f32 %v127_v45, %v116_v1  ;;  %v132_v4 = vmul.f32 %v128_v46, %v116_v1  ;;  %v133_v6 = vmul.f32 %v129_v47, %v116_v1  ;;  %v201_v46 = vld [vmem:[#allocation5] ss:$8 sm:$0xf] }
  0x8b   :  { %v110_v7 = vadd.f32 %v106_v56, %v86_v61  ;;  %v111_v8 = vadd.f32 %v107_v57, %v87_v62  ;;  %v112_v9 = vadd.f32 %v108_v58, %v88_v63  ;;  %v113_v10 = vadd.f32 %v109_v59, %v89_v0  ;;  %v834_v0 = vld [vmem:[#allocation5 + $0x2] ss:$8 sm:$0xf] }
  0x8c   :  { %v821_v45 = vand.u32 127, %v194_v42  ;;  %v205_v47 = vperm.slane %v201_v46, 2  ;;  %v203_v59 = vperm.slane %v201_v46, 0  ;;  %v206_v60 = vperm.slane %v201_v46, 3 }
  0x8d   :  { %v134_v11 = vadd.f32 %v130_v2, %v110_v7  ;;  %v135_v12 = vadd.f32 %v131_v3, %v111_v8  ;;  %v136_v13 = vadd.f32 %v132_v4, %v112_v9  ;;  %v137_v14 = vadd.f32 %v133_v6, %v113_v10  ;;  %v241_v6 = vld [vmem:[#allocation5 + $0x1] ss:$8 sm:$0xf] }
  0x8e   :  { %vm196_vm0 = vcmp.lt.s32.totalorder %v821_v45, 17  ;;  %vm275_vm1 = vcmp.lt.s32.totalorder %v821_v45, 15  ;;  %v283_v7 = vperm.slane %v834_v0, 0  ;;  %vm235_vm2 = vcmp.lt.s32.totalorder %v821_v45, 16 }
  0x8f   :  { %v158_v15 = vadd.f32 %v154_v48, %v134_v11  ;;  %v159_v16 = vadd.f32 %v155_v49, %v135_v12  ;;  %v160_v17 = vadd.f32 %v156_v50, %v136_v13  ;;  %v161_v18 = vadd.f32 %v157_v51, %v137_v14  ;;  %v180_v28 = vpop.permute.xlu0 %179 }
  0x90   :  { %v204_v48 = vperm.slane %v201_v46, 1  ;;  %v243_v11 = vperm.slane %v241_v6, 0  ;;  %v246_v12 = vperm.slane %v241_v6, 3  ;;  %vm315_vm3 = vcmp.lt.s32.totalorder %v821_v45, 1 }
  0x91   :  { %v757_v20 = vmax.f32 %v158_v15, 0.0  ;;  %v759_v21 = vmax.f32 %v159_v16, 0.0  ;;  %v761_v22 = vmax.f32 %v160_v17, 0.0  ;;  %v763_v23 = vmax.f32 %v161_v18, 0.0 }
  0x92   :  { %v257_v39 = vpop.permute.xlu1 %256  ;;  %v244_v15 = vperm.slane %v241_v6, 1  ;;  %v245_v16 = vperm.slane %v241_v6, 2  ;;  %vm355_vm4 = vcmp.lt.s32.totalorder %v821_v45, 127  ;;  %vm395_vm5 = vcmp.lt.s32.totalorder %v821_v45, 113 }
  0x93   :  { %v172_v24 = vmul.f32 %v170_v19, %v757_v20  ;;  %v173_v25 = vmul.f32 %v170_v19, %v759_v21  ;;  %v174_v26 = vmul.f32 %v170_v19, %v761_v22  ;;  %v175_v27 = vmul.f32 %v170_v19, %v763_v23  ;;  %190 = vrot.lane.b32.xlu0 %v761_v22, %s684_s2 }
  0x94   :  { %188 = vrot.lane.b32.xlu2 %v759_v21, %s684_s2  ;;  %186 = vrot.lane.b32.xlu1 %v757_v20, %s684_s2  ;;  %vm435_vm6 = vcmp.lt.s32.totalorder %v821_v45, 112  ;;  %vm475_vm7 = vcmp.lt.s32.totalorder %v821_v45, 111 }
  0x95   :  { %v772_v29 = vadd.f32 %v180_v28, %v172_v24  ;;  %v774_v30 = vadd.f32 %v180_v28, %v173_v25  ;;  %v776_v31 = vadd.f32 %v180_v28, %v174_v26  ;;  %v778_v32 = vadd.f32 %v180_v28, %v175_v27 }
  0x98   :  { %v807_v36 = vpop.permute.xlu0 %296 }
  0x9b   :  { %227 = vrot.lane.b32.xlu0 %v757_v20, %s685_s3  ;;  %v817_v43 = vpop.permute.xlu1 %416 }
  0x9c   :  { %231 = vrot.lane.b32.xlu2 %v761_v22, %s685_s3  ;;  %192 = vrot.lane.b32.xlu1 %v763_v23, %s684_s2 }
  0xa1   :  { %v811_v38 = vpop.permute.xlu0 %336 }
  0xa3   :  { %233 = vrot.lane.b32.xlu0 %v763_v23, %s685_s3 }
  0xa4   :  { %267 = vrot.lane.b32.xlu2 %v757_v20, %s686_s4  ;;  %229 = vrot.lane.b32.xlu1 %v759_v21, %s685_s3 }
  0xaa   :  { %v815_v41 = vpop.permute.xlu0 %376 }
  0xab   :  { %269 = vrot.lane.b32.xlu0 %v759_v21, %s686_s4 }
  0xac   :  { %273 = vrot.lane.b32.xlu2 %v763_v23, %s686_s4  ;;  %271 = vrot.lane.b32.xlu1 %v761_v22, %s686_s4 }
  0xb3   :  { %427 = vrot.lane.b32.xlu0 %v757_v20, %s688_s14 }
  0xb4   :  { %309 = vrot.lane.b32.xlu2 %v759_v21, %s689_s15  ;;  %307 = vrot.lane.b32.xlu1 %v757_v20, %s689_s15 }
  0xbb   :  { %433 = vrot.lane.b32.xlu0 %v763_v23, %s688_s14 }
  0xbc   :  { %313 = vrot.lane.b32.xlu2 %v763_v23, %s689_s15  ;;  %311 = vrot.lane.b32.xlu1 %v761_v22, %s689_s15 }
  0xc3   :  { %469 = vrot.lane.b32.xlu0 %v759_v21, %s690_s16 }
  0xc4   :  { %349 = vrot.lane.b32.xlu2 %v759_v21, %s691_s17  ;;  %347 = vrot.lane.b32.xlu1 %v757_v20, %s691_s17 }
  0xcb   :  { %456 = vperm.xlu0 %592, %v745_v5  }
  0xcc   :  { %353 = vrot.lane.b32.xlu2 %v763_v23, %s691_s17  ;;  %351 = vrot.lane.b32.xlu1 %v761_v22, %s691_s17 }
  0xd3   :  { %594 = vset.pattern.permute.xlu0 %v692_v34 }
  0xd4   :  { %389 = vrot.lane.b32.xlu2 %v759_v21, %s693_s18  ;;  %387 = vrot.lane.b32.xlu1 %v757_v20, %s693_s18 }
  0xdc   :  { %393 = vrot.lane.b32.xlu2 %v763_v23, %s693_s18  ;;  %391 = vrot.lane.b32.xlu1 %v761_v22, %s693_s18 }
  0xe4   :  { %431 = vrot.lane.b32.xlu2 %v761_v22, %s688_s14  ;;  %429 = vrot.lane.b32.xlu1 %v759_v21, %s688_s14 }
  0xec   :  { %467 = vrot.lane.b32.xlu2 %v757_v20, %s690_s16  ;;  %471 = vrot.lane.b32.xlu1 %v761_v22, %s690_s16 }
  0xee   :  { %v189_v37 = vpop.permute.xlu2 %188 }
  0xf4   :  { %473 = vrot.lane.b32.xlu2 %v763_v23, %s690_s16  ;;  %496 = vperm.xlu1 %593, %v745_v5  }
  0xf6   :  { %v232_v40 = vpop.permute.xlu2 %231 }
  0xfe   :  { %v819_v44 = vpop.permute.xlu2 %267 }
 0x105   :  { %v191_v49 = vpop.permute.xlu0 %190 }
 0x106   :  { %v198_v50 = vsel %vm196_vm0, %v189_v37, %v191_v49  ;;  %v826_v5 = vpop.permute.xlu2 %273  ;;  %v187_v51 = vpop.permute.xlu1 %186 }
 0x107   :  { %v213_v52 = vmul.f32 %v205_v47, %v198_v50  ;;  %v199_v53 = vsel %vm196_vm0, %v187_v51, %v189_v37  ;;  %v279_v10 = vsel %vm275_vm1, %v826_v5, %v819_v44 }
 0x108   :  { %v212_v54 = vmul.f32 %v204_v48, %v199_v53  ;;  %v291_v18 = vmul.f32 %v283_v7, %v279_v10  ;;  %v284_v48 = vperm.slane %v834_v0, 1 }
 0x109   :  { %v221_v55 = vmul.f32 %v217_v35, %v213_v52 }
 0x10a   :  { %v220_v56 = vmul.f32 %v217_v35, %v212_v54 }
 0x10b   :  { %v225_v57 = vadd.f32 %v221_v55, %v776_v31 }
 0x10c   :  { %v224_v58 = vadd.f32 %v220_v56, %v774_v30  ;;  %v321_v56 = vld [vmem:[#allocation5 + $0x3] ss:$8 sm:$0xf] }
 0x10d   :  { %v228_v61 = vpop.permute.xlu0 %227 }
 0x10e   :  { %v832_v62 = vpop.permute.xlu2 %309  ;;  %v193_v63 = vpop.permute.xlu1 %192 }
 0x10f   :  { %v197_v1 = vsel %vm196_vm0, %v191_v49, %v193_v63  ;;  %v200_v2 = vsel %vm196_vm0, %v193_v63, %v187_v51 }
 0x110   :  { %v211_v3 = vmul.f32 %v203_v59, %v200_v2  ;;  %v214_v4 = vmul.f32 %v206_v60, %v197_v1  ;;  %v323_v60 = vperm.slane %v321_v56, 0 }
 0x112   :  { %v219_v8 = vmul.f32 %v217_v35, %v211_v3  ;;  %v222_v9 = vmul.f32 %v217_v35, %v214_v4 }
 0x114   :  { %v223_v13 = vadd.f32 %v219_v8, %v772_v29  ;;  %v226_v14 = vadd.f32 %v222_v9, %v778_v32  ;;  %v299_v32 = vmul.f32 %v807_v36, %v291_v18 }
 0x115   :  { %v234_v17 = vpop.permute.xlu0 %233 }
 0x116   :  { %v236_v19 = vsel %vm235_vm2, %v232_v40, %v234_v17  ;;  %v239_v24 = vsel %vm235_vm2, %v234_v17, %v228_v61  ;;  %v230_v25 = vpop.permute.xlu1 %229  ;;  %v314_v31 = vpop.permute.xlu2 %313 }
 0x117   :  { %v251_v26 = vmul.f32 %v243_v11, %v239_v24  ;;  %v254_v27 = vmul.f32 %v246_v12, %v236_v19  ;;  %v237_v28 = vsel %vm235_vm2, %v230_v25, %v232_v40  ;;  %v238_v30 = vsel %vm235_vm2, %v228_v61, %v230_v25 }
 0x118   :  { %v252_v33 = vmul.f32 %v244_v15, %v238_v30  ;;  %v253_v34 = vmul.f32 %v245_v16, %v237_v28  ;;  %v324_v61 = vperm.slane %v321_v56, 1  ;;  %v325_v12 = vperm.slane %v321_v56, 2 }
 0x119   :  { %v259_v35 = vmul.f32 %v257_v39, %v251_v26  ;;  %v262_v37 = vmul.f32 %v257_v39, %v254_v27 }
 0x11a   :  { %v260_v42 = vmul.f32 %v257_v39, %v252_v33  ;;  %v261_v29 = vmul.f32 %v257_v39, %v253_v34 }
 0x11b   :  { %v263_v46 = vadd.f32 %v259_v35, %v223_v13  ;;  %v266_v47 = vadd.f32 %v262_v37, %v226_v14  ;;  %v326_v13 = vperm.slane %v321_v56, 3 }
 0x11c   :  { %v264_v49 = vadd.f32 %v260_v42, %v224_v58  ;;  %v265_v50 = vadd.f32 %v261_v29, %v225_v57  ;;  %v285_v58 = vperm.slane %v834_v0, 2  ;;  %v286_v57 = vperm.slane %v834_v0, 3 }
 0x11d   :  { %v270_v51 = vpop.permute.xlu0 %269  ;;  %v303_v52 = vadd.f32 %v299_v32, %v263_v46  ;;  %v361_v46 = vld [vmem:[#allocation5 + $0x5] ss:$8 sm:$0xf] }
 0x11e   :  { %v278_v40 = vsel %vm275_vm1, %v819_v44, %v270_v51  ;;  %v272_v53 = vpop.permute.xlu1 %271  ;;  %v350_v39 = vpop.permute.xlu2 %349 }
 0x11f   :  { %v292_v54 = vmul.f32 %v284_v48, %v278_v40  ;;  %v276_v44 = vsel %vm275_vm1, %v272_v53, %v826_v5  ;;  %v277_v1 = vsel %vm275_vm1, %v270_v51, %v272_v53  ;;  %v401_v48 = vld [vmem:[#allocation5 + $0x6] ss:$8 sm:$0xf]  ;;  %v441_v51 = vld [vmem:[#allocation5 + $0x7] ss:$8 sm:$0xf] }
 0x120   :  { %v293_v7 = vmul.f32 %v285_v58, %v277_v1  ;;  %v294_v8 = vmul.f32 %v286_v57, %v276_v44  ;;  %v364_v40 = vperm.slane %v361_v46, 1  ;;  %v406_v56 = vperm.slane %v401_v48, 3 }
 0x121   :  { %v300_v55 = vmul.f32 %v807_v36, %v292_v54 }
 0x122   :  { %v301_v14 = vmul.f32 %v807_v36, %v293_v7  ;;  %v302_v15 = vmul.f32 %v807_v36, %v294_v8  ;;  %v481_v7 = vld [vmem:[#allocation5 + $0x20] ss:$8 sm:$0xf] }
 0x123   :  { %v304_v59 = vadd.f32 %v300_v55, %v264_v49  ;;  %v366_v49 = vperm.slane %v361_v46, 3 }
 0x124   :  { %v305_v25 = vadd.f32 %v301_v14, %v265_v50  ;;  %v306_v26 = vadd.f32 %v302_v15, %v266_v47  ;;  %v363_v47 = vperm.slane %v361_v46, 0  ;;  %v365_v50 = vperm.slane %v361_v46, 2 }
 0x125   :  { %v428_v37 = vpop.permute.xlu0 %427  ;;  %v443_v14 = vperm.slane %v441_v51, 0  ;;  %v444_v15 = vperm.slane %v441_v51, 1 }
 0x126   :  { %v308_v63 = vpop.permute.xlu1 %307  ;;  %v354_v10 = vpop.permute.xlu2 %353 }
 0x127   :  { %v318_v2 = vsel %vm315_vm3, %v308_v63, %v832_v62  ;;  %v319_v3 = vsel %vm315_vm3, %v314_v31, %v308_v63  ;;  %v446_v63 = vperm.slane %v441_v51, 3 }
 0x128   :  { %v331_v4 = vmul.f32 %v323_v60, %v319_v3  ;;  %v332_v6 = vmul.f32 %v324_v61, %v318_v2  ;;  %v445_v2 = vperm.slane %v441_v51, 2 }
 0x12a   :  { %v339_v0 = vmul.f32 %v811_v38, %v331_v4  ;;  %v340_v9 = vmul.f32 %v811_v38, %v332_v6  ;;  %v404_v6 = vperm.slane %v401_v48, 1 }
 0x12c   :  { %v870_v5 = vadd.f32 %v339_v0, %v303_v52  ;;  %v872_v11 = vadd.f32 %v340_v9, %v304_v59  ;;  %v405_v59 = vperm.slane %v401_v48, 2 }
 0x12e   :  { %v312_v16 = vpop.permute.xlu1 %311  ;;  %v390_v36 = vpop.permute.xlu2 %389 }
 0x12f   :  { %v316_v17 = vsel %vm315_vm3, %v312_v16, %v314_v31  ;;  %v317_v18 = vsel %vm315_vm3, %v832_v62, %v312_v16  ;;  %v434_v62 = vpop.permute.xlu0 %433 }
 0x130   :  { %v333_v19 = vmul.f32 %v325_v12, %v317_v18  ;;  %v334_v24 = vmul.f32 %v326_v13, %v316_v17  ;;  %v439_v12 = vsel %vm435_vm6, %v434_v62, %v428_v37 }
 0x132   :  { %v341_v27 = vmul.f32 %v811_v38, %v333_v19  ;;  %v342_v28 = vmul.f32 %v811_v38, %v334_v24 }
 0x134   :  { %v883_v30 = vadd.f32 %v341_v27, %v305_v25  ;;  %v885_v33 = vadd.f32 %v342_v28, %v306_v26  ;;  %v483_v25 = vperm.slane %v481_v7, 0 }
 0x136   :  { %v348_v34 = vpop.permute.xlu1 %347  ;;  %v394_v31 = vpop.permute.xlu2 %393 }
 0x137   :  { %v358_v38 = vsel %vm355_vm4, %v348_v34, %v350_v39  ;;  %v359_v52 = vsel %vm355_vm4, %v354_v10, %v348_v34  ;;  %v470_v44 = vpop.permute.xlu0 %469  ;;  %v486_v34 = vperm.slane %v481_v7, 3 }
 0x138   :  { %v371_v60 = vmul.f32 %v363_v47, %v358_v38  ;;  %v374_v1 = vmul.f32 %v366_v49, %v359_v52  ;;  %v484_v49 = vperm.slane %v481_v7, 1  ;;  %v485_v38 = vperm.slane %v481_v7, 2 }
 0x13a   :  { %v379_v13 = vmul.f32 %v815_v41, %v371_v60  ;;  %v382_v16 = vmul.f32 %v815_v41, %v374_v1 }
 0x13e   :  { %v352_v35 = vpop.permute.xlu1 %351  ;;  %v432_v29 = vpop.permute.xlu2 %431 }
 0x13f   :  { %v356_v53 = vsel %vm355_vm4, %v352_v35, %v354_v10  ;;  %v357_v55 = vsel %vm355_vm4, %v350_v39, %v352_v35  ;;  %v403_v39 = vperm.slane %v401_v48, 0  ;;  %v436_v28 = vsel %vm435_vm6, %v432_v29, %v434_v62  ;;  %v457_v52 = vpop.permute.xlu0 %456 }
 0x140   :  { %v373_v3 = vmul.f32 %v365_v50, %v356_v53  ;;  %v372_v4 = vmul.f32 %v364_v40, %v357_v55  ;;  %v453_v50 = vmul.f32 %v445_v2, %v436_v28 }
 0x142   :  { %v381_v17 = vmul.f32 %v815_v41, %v373_v3  ;;  %v380_v24 = vmul.f32 %v815_v41, %v372_v4  ;;  %v386_v41 = vadd.f32 %v382_v16, %v885_v33 }
 0x144   :  { %v385_v48 = vadd.f32 %v381_v17, %v883_v30 }
 0x146   :  { %v388_v42 = vpop.permute.xlu1 %387  ;;  %v468_v54 = vpop.permute.xlu2 %467 }
 0x147   :  { %v399_v61 = vsel %vm395_vm5, %v394_v31, %v388_v42  ;;  %v398_v8 = vsel %vm395_vm5, %v388_v42, %v390_v36  ;;  %v383_v42 = vadd.f32 %v379_v13, %v870_v5  ;;  %v478_v5 = vsel %vm475_vm7, %v468_v54, %v470_v44 }
 0x148   :  { %v414_v0 = vmul.f32 %v406_v56, %v399_v61  ;;  %v411_v26 = vmul.f32 %v403_v39, %v398_v8 }
 0x14a   :  { %v419_v62 = vmul.f32 %v817_v43, %v411_v26 }
 0x14e   :  { %v392_v32 = vpop.permute.xlu1 %391 }
 0x14f   :  { %v396_v58 = vsel %vm395_vm5, %v392_v32, %v394_v31  ;;  %v397_v9 = vsel %vm395_vm5, %v390_v36, %v392_v32  ;;  %v422_v36 = vmul.f32 %v817_v43, %v414_v0  ;;  %v454_v31 = vmul.f32 %v446_v63, %v439_v12  ;;  %v474_v32 = vpop.permute.xlu2 %473 }
 0x150   :  { %v413_v10 = vmul.f32 %v405_v59, %v396_v58  ;;  %v412_v27 = vmul.f32 %v404_v6, %v397_v9  ;;  %v479_v53 = vsel %vm475_vm7, %v474_v32, %v468_v54  ;;  %v461_v59 = vmul.f32 %v457_v52, %v453_v50 }
 0x151   :  { %v426_v40 = vadd.f32 %v422_v36, %v386_v41  ;;  %v462_v60 = vmul.f32 %v457_v52, %v454_v31  ;;  %v491_v58 = vmul.f32 %v483_v25, %v478_v5 }
 0x152   :  { %v421_v35 = vmul.f32 %v817_v43, %v413_v10  ;;  %v420_v51 = vmul.f32 %v817_v43, %v412_v27  ;;  %v423_v43 = vadd.f32 %v419_v62, %v383_v42 }
 0x153   :  { %v466_v4 = vadd.f32 %v462_v60, %v426_v40 }
 0x154   :  { %v425_v33 = vadd.f32 %v421_v35, %v385_v48 }
 0x156   :  { %v430_v57 = vpop.permute.xlu1 %429  ;;  %v465_v54 = vadd.f32 %v461_v59, %v425_v33 }
 0x157   :  { %v437_v18 = vsel %vm435_vm6, %v430_v57, %v432_v29  ;;  %v438_v19 = vsel %vm435_vm6, %v428_v37, %v430_v57  ;;  %v384_v29 = vadd.f32 %v380_v24, %v872_v11  ;;  %v494_v57 = vmul.f32 %v486_v34, %v479_v53 }
 0x158   :  { %v451_v46 = vmul.f32 %v443_v14, %v438_v19  ;;  %v452_v47 = vmul.f32 %v444_v15, %v437_v18 }
 0x159   :  { %v424_v61 = vadd.f32 %v420_v51, %v384_v29 }
 0x15a   :  { %v459_v55 = vmul.f32 %v457_v52, %v451_v46  ;;  %v460_v30 = vmul.f32 %v457_v52, %v452_v47 }
 0x15c   :  { %v463_v2 = vadd.f32 %v459_v55, %v423_v43  ;;  %v464_v3 = vadd.f32 %v460_v30, %v424_v61 }
 0x15e   :  { %v472_v37 = vpop.permute.xlu1 %471 }
 0x15f   :  { %v476_v56 = vsel %vm475_vm7, %v472_v37, %v474_v32  ;;  %v477_v11 = vsel %vm475_vm7, %v470_v44, %v472_v37 }
 0x160   :  { %v492_v63 = vmul.f32 %v484_v49, %v477_v11  ;;  %v493_v1 = vmul.f32 %v485_v38, %v476_v56 }
 0x166   :  { %v497_v39 = vpop.permute.xlu1 %496 }
 0x167   :  { %v499_v6 = vmul.f32 %v497_v39, %v491_v58  ;;  %v500_v7 = vmul.f32 %v497_v39, %v492_v63  ;;  %v501_v8 = vmul.f32 %v497_v39, %v493_v1  ;;  %v502_v0 = vmul.f32 %v497_v39, %v494_v57 }
 0x169   :  { %v503_v9 = vadd.f32 %v499_v6, %v463_v2  ;;  %v504_v45 = vadd.f32 %v500_v7, %v464_v3  ;;  %v505_v44 = vadd.f32 %v501_v8, %v465_v54  ;;  %v506_v10 = vadd.f32 %v502_v0, %v466_v4 }
 0x16b   :  { %v507_v12 = vmax.f32 %v503_v9, 0.0  ;;  %v508_v13 = vmax.f32 %v504_v45, 0.0  ;;  %v509_v14 = vmax.f32 %v505_v44, 0.0  ;;  %v510_v15 = vmax.f32 %v506_v10, 0.0 }
 0x16d   :  { %v515_v16 = vrot.slane %v507_v12, 6  ;;  %v516_v17 = vrot.slane %v508_v13, 6  ;;  %v517_v18 = vrot.slane %v509_v14, 6  ;;  %v518_v19 = vrot.slane %v510_v15, 6 }
 0x16f   :  { %v525_v24 = vsel %vm523_vm8, %v759_v21, %v516_v17  ;;  %v527_v25 = vsel %vm523_vm8, %v763_v23, %v518_v19  ;;  %v524_v28 = vsel %vm523_vm8, %v757_v20, %v515_v16  ;;  %v526_v36 = vsel %vm523_vm8, %v761_v22, %v517_v18 }
 0x170   :  { %v532_v26 = vrot.slane %v525_v24, 4  ;;  %v533_v27 = vrot.slane %v527_v25, 4 }
 0x172   :  { %v535_v34 = vsel %vm534_vm9, %v524_v28, %v532_v26  ;;  %v536_v35 = vsel %vm534_vm9, %v526_v36, %v533_v27 }
 0x173   :  { %539 = vst [vmem:[#allocation7] sm:$0xff] %v535_v34 }
 0x174   :  { %540 = vst [vmem:[#allocation7 + $0x8] sm:$0xff] %v536_v35 }
 0x175   :  { %551 = dma.vmem_to_hbm [thread:$0]  %s547_s20, 256, %s549_s23, [#allocation4]  }
 0x176   :  { %671 = dma.done.wait [#allocation4], 256  }
 0x177   :  { %672 = vsyncadd [#allocation4], 4294967040 }
 0x178   :  { %556 = vsyncpa [#allocation3], 1 }
 0x179   :  { %557 = vsyncpa [#allocation6], 1 }
 0x17a   :  { %558 = vsyncpa [#allocation4], 1 }

</bundles_post_ra>
